<compile_context>
chip_gen: v7x
topology: tpu7x:2x2x1
jax: 0.10.0
libtpu: 0.0.40
codegen_flags: <defaults>
</compile_context>

<pallas_src>
import functools

import jax
import jax.numpy as jnp
from jax.experimental import pallas as pl
from jax.experimental.pallas import tpu as pltpu


def _round_up(x, m):
    return (x + m - 1) // m * m


def _pick_tile(size, target, align):
    """Largest multiple of `align` that divides `size` and is <= max(target, align).

    `size` must itself be a multiple of `align` (guaranteed by padding)."""
    t = min(size, max(align, (target // align) * align))
    while size % t != 0:
        t -= align
    return t


def _vmem_capacity_bytes():
    try:
        cap = getattr(pltpu.get_tpu_info(), "vmem_capacity_bytes", None)
        if cap:
            return int(cap)
    except Exception:
        pass
    return 64 * 1024 * 1024  # conservative: v7x per-TC VMEM


# --------------------------------------------------------------------------
# Kernels
# --------------------------------------------------------------------------
def _linear_single_block_kernel(x_ref, w_ref, b_ref, o_ref):
    """Whole (padded) problem in one VMEM block: y = x @ W^T + b."""
    o_ref[...] = (
        jnp.dot(x_ref[...], w_ref[...], preferred_element_type=jnp.float32)
        + b_ref[...]
    ).astype(o_ref.dtype)


def _linear_tiled_kernel(x_ref, w_ref, b_ref, o_ref):
    """One (tm, tn) output tile, accumulated in-place over the K grid axis.

    x_ref: (tm, tk)  activation tile
    w_ref: (tk, tn)  pre-transposed weight tile (W^T layout)
    b_ref: (1,  tn)  bias tile (resident across K and M)
    o_ref: (tm, tn)  f32 output tile == K-resident accumulator (no scratch)
    """
    k = pl.program_id(2)

    @pl.when(k == 0)
    def _():
        o_ref[...] = jnp.zeros_like(o_ref)

    o_ref[...] += jnp.dot(x_ref[...], w_ref[...],
                          preferred_element_type=jnp.float32)

    @pl.when(k == pl.num_programs(2) - 1)
    def _():
        o_ref[...] += b_ref[...]


# --------------------------------------------------------------------------
# Module wrapper (prepare-once, call-many)
# --------------------------------------------------------------------------
class PallasLinear:
    """Pallas TPU equivalent of torch.nn.Linear: y = x @ weight.T + bias.

    weight: (output_dim, input_dim)  -- PyTorch layout
    bias:   (output_dim,)
    """

    def __init__(self, weight, bias, *, tm=None, tn=None, tk=None,
                 compute_dtype=jnp.float32):
        N, K = weight.shape
        self.N, self.K = N, K
        self._vmem_cap = _vmem_capacity_bytes()
        self._small_vmem = self._vmem_cap <= 64 * 1024 * 1024  # v7x-class

        # Bigger tiles on 128 MiB-VMEM chips (v5e/v6e); modest on v7x where
        # 3.2 TB/s HBM keeps smaller tiles on-roofline and VMEM is scarce.
        self._tm_target = tm if tm is not None else (256 if self._small_vmem else 512)
        tn_t = tn if tn is not None else (256 if self._small_vmem else 512)
        tk_t = tk if tk is not None else 512

        # Pad params once to (8,128)-granularity; pre-transpose W to (Kp, Np)
        # so the kernel contracts with a canonical dot (no per-step relayout).
        Kp, Np = _round_up(K, 128), _round_up(N, 128)
        self.Kp, self.Np = Kp, Np
        w_p = weight
        if Np != N or Kp != K:
            w_p = jnp.pad(weight, ((0, Np - N), (0, Kp - K)))
        self._compute_dtype = compute_dtype
        self.w_t = jnp.asarray(w_p.T, dtype=compute_dtype)          # (Kp, Np)
        b_p = bias if Np == N else jnp.pad(bias, (0, Np - N))
        self.b2d = jnp.asarray(b_p, dtype=jnp.float32).reshape(1, Np)

        # tn / tk fixed once as divisors of the padded parameter dims.
        self.tn = _pick_tile(Np, tn_t, 128)
        self.tk = _pick_tile(Kp, tk_t, 128)

    # -- small problems: one block, no grid machinery --------------------
    def _single_block(self, x_p, Bp):
        Kp, Np = self.Kp, self.Np
        return pl.pallas_call(
            _linear_single_block_kernel,
            out_shape=jax.ShapeDtypeStruct((Bp, Np), jnp.float32),
            grid_spec=pltpu.PrefetchScalarGridSpec(
                num_scalar_prefetch=0,
                grid=(1,),
                in_specs=[
                    pl.BlockSpec((Bp, Kp), lambda i: (0, 0)),
                    pl.BlockSpec((Kp, Np), lambda i: (0, 0)),
                    pl.BlockSpec((1, Np), lambda i: (0, 0)),
                ],
                out_specs=pl.BlockSpec((Bp, Np), lambda i: (0, 0)),
            ),
            compiler_params=pltpu.CompilerParams(
                dimension_semantics=("arbitrary",),
            ),
        )(x_p, self.w_t, self.b2d)

    # -- general tiled path ----------------------------------------------
    def _tiled(self, x_p, Bp, tm, tn, tk):
        Kp, Np = self.Kp, self.Np
        grid = (Bp // tm, Np // tn, Kp // tk)

        bpe = jnp.dtype(self._compute_dtype).itemsize
        # Double-buffered x / W^T / bias tiles + double-buffered f32 out tile.
        tile_bytes = (2 * tm * tk * bpe + 2 * tk * tn * bpe
                      + 2 * tn * 4 + 2 * tm * tn * 4)
        vmem_limit = int(min(0.75 * self._vmem_cap,
                             max(2 * tile_bytes, 16 * 1024 * 1024)))
        vmem_limit = max(vmem_limit, tile_bytes + (1 << 20))

        return pl.pallas_call(
            _linear_tiled_kernel,
            out_shape=jax.ShapeDtypeStruct((Bp, Np), jnp.float32),
            grid_spec=pltpu.PrefetchScalarGridSpec(
                num_scalar_prefetch=0,
                grid=grid,
                in_specs=[
                    pl.BlockSpec((tm, tk), lambda i, j, k: (i, k)),   # x
                    pl.BlockSpec((tk, tn), lambda i, j, k: (k, j)),   # W^T
                    pl.BlockSpec((1, tn), lambda i, j, k: (0, j)),    # bias
                ],
                out_specs=pl.BlockSpec((tm, tn), lambda i, j, k: (i, j)),
            ),
            compiler_params=pltpu.CompilerParams(
                dimension_semantics=("parallel", "parallel", "arbitrary"),
                vmem_limit_bytes=vmem_limit,
            ),
        )(x_p, self.w_t, self.b2d)

    def __call__(self, x):
        B, K = x.shape
        assert K == self.K, f"expected input_dim={self.K}, got {K}"
        Bp, Kp, Np = _round_up(B, 8), self.Kp, self.Np

        x_p = x.astype(self._compute_dtype)
        if Bp != B or Kp != K:
            # Zero padding along K is exact; padded rows are sliced away.
            x_p = jnp.pad(x_p, ((0, Bp - B), (0, Kp - K)))

        tm = _pick_tile(Bp, self._tm_target, 8)
        tn, tk = self.tn, self.tk
        gm, gn, gk = Bp // tm, Np // tn, Kp // tk

        if (gm, gn, gk) == (1, 1, 1):
            out_p = self._single_block(x_p, Bp)
        else:
            # v7x (2 TC/chip): make sure some "parallel" axis has >= 2 blocks.
            if self._small_vmem and gm == 1 and gn == 1 and Np >= 256:
                tn = _pick_tile(Np, Np // 2, 128)
            out_p = self._tiled(x_p, Bp, tm, tn, tk)

        if Bp == B and Np == self.N:
            return out_p
        return out_p[:B, :self.N]


# Functional convenience wrapper (matches the old API).
def linear_regression_forward(x, weight, bias, **kwargs):
    return PallasLinear(weight, bias, **kwargs)(x)


if __name__ == "__main__":
    key = jax.random.PRNGKey(0)

    # --- Shapes implied by the module: input_dim=32, output_dim=16, batch=8.
    batch, input_dim, output_dim = 8, 32, 16
    kx, kw, kb, k2 = jax.random.split(key, 4)

    bound = 1.0 / float(input_dim) ** 0.5
    weight = jax.random.uniform(kw, (output_dim, input_dim),
                                minval=-bound, maxval=bound, dtype=jnp.float32)
    bias = jax.random.uniform(kb, (output_dim,),
                              minval=-bound, maxval=bound, dtype=jnp.float32)
    x = jax.random.normal(kx, (batch, input_dim), dtype=jnp.float32)

    lin = PallasLinear(weight, bias)          # single-block fast path
    y = jax.block_until_ready(lin(x))
    y_ref = x @ weight.T + bias
    assert y.shape == (batch, output_dim)
    assert jnp.allclose(y, y_ref, atol=1e-5, rtol=1e-5)

    # --- Awkward shapes: exercises (8,128) padding, divisor tile selection,
    #     output slicing, and the multi-step K reduction of the tiled path.
    B2, K2, N2 = 300, 640, 384
    kx2, kw2, kb2 = jax.random.split(k2, 3)
    w2 = jax.random.normal(kw2, (N2, K2), dtype=jnp.float32) * 0.05
    b2 = jax.random.normal(kb2, (N2,), dtype=jnp.float32) * 0.05
    x2 = jax.random.normal(kx2, (B2, K2), dtype=jnp.float32)

    lin2 = PallasLinear(w2, b2)               # tiled path (K grid > 1)
    y2 = jax.block_until_ready(lin2(x2))
    y2_ref = x2 @ w2.T + b2
    assert y2.shape == (B2, N2)
    assert jnp.allclose(y2, y2_ref, atol=2e-4, rtol=1e-4)

    print("KERNEL_OK")
</pallas_src>

<mosaic_0001>
module attributes {stable_mosaic.version = 11 : i64} {
  func.func @_linear_single_block_kernel(%arg0: i32, %arg1: memref<8x128xf32, #tpu.memory_space<vmem>>, %arg2: memref<128x128xf32, #tpu.memory_space<vmem>>, %arg3: memref<1x128xf32, #tpu.memory_space<vmem>>, %arg4: memref<8x128xf32, #tpu.memory_space<vmem>>) attributes {dimension_semantics = [#tpu.dimension_semantics<arbitrary>], iteration_bounds = array<i64: 1>, scalar_prefetch = 0 : i64, scratch_operands = 0 : i64, tpu.core_type = #tpu.core_type<tc>, window_params = [{pipeline_mode = #tpu.pipeline_mode<synchronous>, transform_indices = @transform_0, window_bounds = array<i64: 8, 128>}, {pipeline_mode = #tpu.pipeline_mode<synchronous>, transform_indices = @transform_1, window_bounds = array<i64: 128, 128>}, {pipeline_mode = #tpu.pipeline_mode<synchronous>, transform_indices = @transform_2, window_bounds = array<i64: 1, 128>}, {pipeline_mode = #tpu.pipeline_mode<synchronous>, transform_indices = @transform_3, window_bounds = array<i64: 8, 128>}]} {
    %c0 = arith.constant 0 : index
    %c0_0 = arith.constant 0 : index
    %0 = vector.load %arg1[%c0, %c0_0] : memref<8x128xf32, #tpu.memory_space<vmem>>, vector<8x128xf32>
    %c0_1 = arith.constant 0 : index
    %c0_2 = arith.constant 0 : index
    %1 = vector.load %arg2[%c0_1, %c0_2] : memref<128x128xf32, #tpu.memory_space<vmem>>, vector<128x128xf32>
    %cst = arith.constant dense<0.000000e+00> : vector<8x128xf32>
    %2 = tpu.matmul %0, %1, %cst {dimension_numbers = #tpu.dot_dimension_numbers<[1], [0], [0], [1], [0, 0, 1, 1], [], []>} : vector<8x128xf32>, vector<128x128xf32>, vector<8x128xf32> -> vector<8x128xf32>
    %c0_3 = arith.constant 0 : index
    %c0_4 = arith.constant 0 : index
    %3 = vector.load %arg3[%c0_3, %c0_4] : memref<1x128xf32, #tpu.memory_space<vmem>>, vector<1x128xf32>
    %4 = vector.broadcast %3 : vector<1x128xf32> to vector<8x128xf32>
    %5 = arith.addf %2, %4 : vector<8x128xf32>
    %c0_5 = arith.constant 0 : index
    %c0_6 = arith.constant 0 : index
    %6 = vector.load %arg4[%c0_5, %c0_6] : memref<8x128xf32, #tpu.memory_space<vmem>>, vector<8x128xf32>
    tpu.vector_store %arg4[%c0_5, %c0_6], %5 {strides = array<i32>} : memref<8x128xf32, #tpu.memory_space<vmem>>, vector<8x128xf32>,
    return
  }
  func.func @transform_0(%arg0: i32) -> (i32, i32) {
    %c0_i32 = arith.constant 0 : i32
    %c0_i32_0 = arith.constant 0 : i32
    %c0_i32_1 = arith.constant 0 : i32
    return %c0_i32, %c0_i32_0 : i32, i32
  }
  func.func @transform_1(%arg0: i32) -> (i32, i32) {
    %c0_i32 = arith.constant 0 : i32
    %c0_i32_0 = arith.constant 0 : i32
    %c0_i32_1 = arith.constant 0 : i32
    return %c0_i32, %c0_i32_0 : i32, i32
  }
  func.func @transform_2(%arg0: i32) -> (i32, i32) {
    %c0_i32 = arith.constant 0 : i32
    %c0_i32_0 = arith.constant 0 : i32
    %c0_i32_1 = arith.constant 0 : i32
    return %c0_i32, %c0_i32_0 : i32, i32
  }
  func.func @transform_3(%arg0: i32) -> (i32, i32) {
    %c0_i32 = arith.constant 0 : i32
    %c0_i32_0 = arith.constant 0 : i32
    %c0_i32_1 = arith.constant 0 : i32
    return %c0_i32, %c0_i32_0 : i32, i32
  }
}

</mosaic_0001>

<bundles_post_ra>
// kernel: tpu_custom_call.1
= control target key start
LH: loop header
LB: loop body
LE: loop exit
PB: predicated region body
PF: predicated region fallthrough
CT: control target
= control target key end

     0   :  { %8 = vsyncpa [#allocation3], 0  ;;  %s383_s0 = inlined_call_operand.hbm [shape: f32[8,128], index: 0, kind: input, shape index: {}]   ;;  %s384_s1 = inlined_call_operand.hbm [shape: f32[128,128], index: 1, kind: input, shape index: {}]   ;;  %s385_s2 = inlined_call_operand.vmem [shape: f32[1,128], index: 2, kind: input, shape index: {}]   ;;  %s386_s3 = inlined_call_operand.hbm [shape: f32[8,128], index: 3, kind: output, shape index: {}]  }
   0x1   :  { %9 = vsyncpa [#allocation6], 0 }
   0x2   :  { %10 = vsyncpa [#allocation4], 0  ;;  %s309_s12 = smov [#allocation2]   ;;  %s310_s14 = smov [#allocation5]  }
   0x3   :  { %s17_s13 = sshll.u32 %s309_s12, 4  ;;  %s26_s15 = sshll.u32 %s310_s14, 4  ;;  %s18_s13 = int_to_ptr.vmem [resolvable:$true] %s17_s13  ;;  %s337_s15 = int_to_ptr.vmem [resolvable:$true] %s26_s15 }
   0x4   :  { %s237_s18 = scalar_lea.hbm %s383_s0, 128 }
   0x5   :  { %p238_p0 = scmp.ne.s32.totalorder %s383_s0, %s237_s18  ;;  %p241_p1 = scmp.lt.u32.totalorder %s237_s18, %s383_s0 }
   0x7   :  { %p243_p2 = pnand %p241_p1, %p238_p0 }
   0x9   :  { %246 = shalt.err (!%p243_p2)
}
   0xa   :  { %s247_s23 = scalar_lea.vmem %s18_s13, 128  ;;  %p252_p4 = scmp.lt.s32.totalorder %s18_s13, %s18_s13 }
   0xb   :  { %p248_p3 = scmp.ne.s32.totalorder %s18_s13, %s247_s23  ;;  %p253_p5 = scmp.lt.s32.totalorder %s247_s23, %s247_s23 }
   0xd   :  { %p254_p6 = por %p253_p5, %p252_p4 }
   0xf   :  { %p255_p7 = pnand %p254_p6, %p248_p3 }
  0x11   :  { %258 = shalt.err (!%p255_p7)
}
  0x12   :  { %20 = dma.hbm_to_vmem [thread:$0]  %s383_s0, 128, %s18_s13, [#allocation3]  }
  0x13   :  { %s259_s28 = scalar_lea.hbm %s384_s1, 2048 }
  0x14   :  { %p260_p8 = scmp.ne.s32.totalorder %s384_s1, %s259_s28  ;;  %p263_p9 = scmp.lt.u32.totalorder %s259_s28, %s384_s1 }
  0x16   :  { %p265_p10 = pnand %p263_p9, %p260_p8 }
  0x18   :  { %268 = shalt.err (!%p265_p10)
}
  0x19   :  { %s269_s6 = scalar_lea.vmem %s337_s15, 2048  ;;  %p274_p12 = scmp.lt.s32.totalorder %s337_s15, %s337_s15 }
  0x1a   :  { %p270_p11 = scmp.ne.s32.totalorder %s337_s15, %s269_s6  ;;  %p275_p13 = scmp.lt.s32.totalorder %s269_s6, %s269_s6 }
  0x1c   :  { %p276_p0 = por %p275_p13, %p274_p12 }
  0x1e   :  { %p277_p1 = pnand %p276_p0, %p270_p11 }
  0x20   :  { %280 = shalt.err (!%p277_p1)
}
  0x21   :  { %s311_s0 = smov 128   ;;  %s312_s7 = smov 8  }
  0x22   :  { %32 = dma.hbm_to_vmem [thread:$0]  %s384_s1, 2048, %s337_s15, [#allocation6], %s311_s0, %s311_s0, %s312_s7  }
  0x23   :  { %303 = dma.done.wait [#allocation3], 128  }
  0x24   :  { %304 = vsyncadd [#allocation3], 4294967168 }
  0x25   :  { %305 = dma.done.wait [#allocation6], 2048  }
  0x26   :  { %306 = vsyncadd [#allocation6], 4294965248  ;;  %v313_v0 = vmov 0.0|0.0   ;;  %vm314_vm0 = vmmov 0   ;;  %v315_v1 = vmov 0.0   ;;  %v42_v2 = vld [vmem:[#allocation5] sm:$0xff] }
  0x27   :  { %205 = vmatprep.subr.bf16.mxu0 %v313_v0  ;;  %202 = vmatprep.mubr.msk.f32.mxu0 %vm314_vm0, %v315_v1  ;;  %v43_v3 = vld [vmem:[#allocation5 + $0x8] sm:$0xff]  ;;  %v44_v4 = vld [vmem:[#allocation5 + $0x10] sm:$0xff]  ;;  %v45_v6 = vld [vmem:[#allocation5 + $0x18] sm:$0xff]  ;;  %s316_s11 = smov [#allocation7]  }
  0x28   :  { %v206_v5 = vpack.c.bf16 %v43_v3, %v42_v2  ;;  %v209_v7 = vpack.c.bf16 %v45_v6, %v44_v4  ;;  %v46_v8 = vld [vmem:[#allocation5 + $0x20] sm:$0xff]  ;;  %v47_v9 = vld [vmem:[#allocation5 + $0x28] sm:$0xff]  ;;  %v48_v11 = vld [vmem:[#allocation5 + $0x30] sm:$0xff]  ;;  %s142_s12 = sshll.u32 %s316_s11, 4  ;;  %s143_s12 = int_to_ptr.vmem [resolvable:$true] %s142_s12 }
  0x29   :  { %v212_v10 = vpack.c.bf16 %v47_v9, %v46_v8  ;;  %v49_v12 = vld [vmem:[#allocation5 + $0x38] sm:$0xff]  ;;  %v50_v14 = vld [vmem:[#allocation5 + $0x40] sm:$0xff]  ;;  %v51_v15 = vld [vmem:[#allocation5 + $0x48] sm:$0xff]  ;;  %s281_s13 = scalar_lea.vmem %s143_s12, 128  ;;  %p286_p3 = scmp.lt.s32.totalorder %s143_s12, %s143_s12 }
  0x2a   :  { %207 = vmatpush3.bf16.msra.mxu0 %v206_v5  ;;  %v215_v13 = vpack.c.bf16 %v49_v12, %v48_v11  ;;  %v218_v16 = vpack.c.bf16 %v51_v15, %v50_v14  ;;  %v52_v17 = vld [vmem:[#allocation5 + $0x50] sm:$0xff]  ;;  %v53_v18 = vld [vmem:[#allocation5 + $0x58] sm:$0xff]  ;;  %v54_v20 = vld [vmem:[#allocation5 + $0x60] sm:$0xff]  ;;  %p282_p2 = scmp.ne.s32.totalorder %s143_s12, %s281_s13  ;;  %p287_p4 = scmp.lt.s32.totalorder %s281_s13, %s281_s13 }
  0x2b   :  { %208 = vmatprep.subr.bf16.mxu0 %v313_v0  ;;  %v221_v19 = vpack.c.bf16 %v53_v18, %v52_v17  ;;  %v55_v21 = vld [vmem:[#allocation5 + $0x68] sm:$0xff]  ;;  %v56_v23 = vld [vmem:[#allocation5 + $0x70] sm:$0xff]  ;;  %v57_v24 = vld [vmem:[#allocation5 + $0x78] sm:$0xff] }
  0x2c   :  { %v224_v22 = vpack.c.bf16 %v55_v21, %v54_v20  ;;  %v227_v25 = vpack.c.bf16 %v57_v24, %v56_v23  ;;  %v41_v26 = vld [vmem:[#allocation2] sm:$0xff]  ;;  %p288_p5 = por %p287_p4, %p286_p3 }
  0x2d   :  { %v152_v27 = vld [vmem:[%s385_s2] ss:$0 sm:$0xff] }
  0x2e   :  { %210 = vmatpush3.bf16.msra.mxu0 %v209_v7  ;;  %p289_p6 = pnand %p288_p5, %p282_p2 }
  0x2f   :  { %211 = vmatprep.subr.bf16.mxu0 %v313_v0 }
  0x32   :  { %213 = vmatpush3.bf16.msra.mxu0 %v212_v10 }
  0x33   :  { %214 = vmatprep.subr.bf16.mxu0 %v313_v0 }
  0x36   :  { %216 = vmatpush3.bf16.msra.mxu0 %v215_v13 }
  0x37   :  { %217 = vmatprep.subr.bf16.mxu0 %v313_v0 }
  0x3a   :  { %219 = vmatpush3.bf16.msra.mxu0 %v218_v16 }
  0x3b   :  { %220 = vmatprep.subr.bf16.mxu0 %v313_v0 }
  0x3e   :  { %222 = vmatpush3.bf16.msra.mxu0 %v221_v19 }
  0x3f   :  { %223 = vmatprep.subr.bf16.mxu0 %v313_v0 }
  0x42   :  { %225 = vmatpush3.bf16.msra.mxu0 %v224_v22 }
  0x43   :  { %226 = vmatprep.subr.bf16.mxu0 %v313_v0 }
  0x46   :  { %228 = vmatpush3.bf16.msra.mxu0 %v227_v25 }
  0x49   :  { %203 = vmatmul.mubr.f32.vlgmr.msra.gmra.mrb[0].mxu0 %v41_v26 }
 0x11c   :  { %v131_v28 = vpop.f32.mrb[0].mxu0 }
 0x11d   :  { %v132_v29 = vadd.f32 %v152_v27, %v131_v28  ;;  %v204_v30 = vpop.f32.mrb[1].mxu0 }
 0x11f   :  { %135 = vst [vmem:[#allocation7] sm:$0xff] %v132_v29 }
 0x120   :  { %292 = shalt.err (!%p289_p6)
}
 0x121   :  { %s293_s16 = scalar_lea.hbm %s386_s3, 128 }
 0x122   :  { %p294_p7 = scmp.ne.s32.totalorder %s386_s3, %s293_s16  ;;  %p297_p8 = scmp.lt.u32.totalorder %s293_s16, %s386_s3 }
 0x124   :  { %p299_p9 = pnand %p297_p8, %p294_p7 }
 0x126   :  { %302 = shalt.err (!%p299_p9)
}
 0x127   :  { %145 = dma.vmem_to_hbm [thread:$0]  %s143_s12, 128, %s386_s3, [#allocation4]  }
 0x128   :  { %307 = dma.done.wait [#allocation4], 128  }
 0x129   :  { %308 = vsyncadd [#allocation4], 4294967168 }
 0x12a   :  { %149 = vsyncpa [#allocation3], 1 }
 0x12b   :  { %150 = vsyncpa [#allocation6], 1 }
 0x12c   :  { %151 = vsyncpa [#allocation4], 1 }

</bundles_post_ra>
